<compile_context>
chip_gen: v7x
topology: tpu7x:2x2x1
jax: 0.10.0
libtpu: 0.0.40
codegen_flags: <defaults>
</compile_context>

<pallas_src>
import functools
import math

import numpy as np
import jax
import jax.numpy as jnp
from jax import lax
from jax.experimental import pallas as pl
from jax.experimental.pallas import tpu as pltpu


_LANES = 128
_MIB = 1024 * 1024
_FUSED_BN_X_BYTES = 4 * _MIB        # f32 working set of x for the fused BN path
_FUSED_GN_X_BYTES = 2 * _MIB        # f32 working set of x for the fused GN path
_ONEHOT_BUDGET_BYTES = 2 * _MIB     # per one-hot (N or TN rows x Bp graphs, f32)
_TILE_BUDGET_BYTES = 2 * _MIB       # per streamed input tile (double-buffered)
_VMEM_LIMIT = 32 * _MIB             # safe on v5e / v6e / v7x
_MAX_PACKED_LANES = 512             # cap on k*H for the lane-packing trick


# ----------------------------------------------------------------------------
# Helpers
# ----------------------------------------------------------------------------
def _cdiv(a, b):
    return -(-a // b)


def _round_up(a, m):
    return _cdiv(a, m) * m


def _pick_tile_rows(n, row_bytes, budget=_TILE_BUDGET_BYTES):
    """Rows per streamed block: large enough to amortize the ~0.35us per-grid-step
    cost, small enough that double-buffered in+out tiles stay well inside the
    scoped-VMEM limit on every generation."""
    rows = max(8, budget // max(int(row_bytes), 1))
    rows = max(8, (rows // 8) * 8)
    return n if rows >= n else rows


def _clamp_tile_rows(tn, n_rows):
    tn = min(tn, n_rows)
    if tn < n_rows:
        tn = max(8, (tn // 8) * 8)
    return tn


def _lane_packing(n, h):
    """Packing factor k: reshaping (N, H) -> (N/k, k*H) makes the last dim a
    multiple of 128 lanes (a free row-major metadata reshape).  k == 1 means
    'keep as-is' (already lane-dense, or N not divisible by k)."""
    if h % _LANES == 0:
        return 1
    k = _LANES // math.gcd(h, _LANES)
    if k > 1 and n % k == 0 and k * h <= _MAX_PACKED_LANES:
        return k
    return 1


def _chunk_block_matrix(kh, h):
    # B[i, j] = 1 iff lanes i, j belong to the same original row-chunk (i//h == j//h).
    ri = lax.broadcasted_iota(jnp.int32, (kh, kh), 0) // h
    ci = lax.broadcasted_iota(jnp.int32, (kh, kh), 1) // h
    return (ri == ci).astype(jnp.float32)


def _fold_matrix(kh, h):
    # P[i, j] = 1 iff lanes i, j map to the same original column (i%h == j%h).
    ri = lax.broadcasted_iota(jnp.int32, (kh, kh), 0) % h
    ci = lax.broadcasted_iota(jnp.int32, (kh, kh), 1) % h
    return (ri == ci).astype(jnp.float32)


# ----------------------------------------------------------------------------
# LayerNorm: single tiled pass (per-row stats), "parallel" over row tiles.
# In the packed (N/k, k*H) layout the per-original-row mean/var are computed
# with a (kH, kH) block-diagonal matmul on the MXU so no in-kernel relayout
# reshape is needed and the store stays lane-dense.
# ----------------------------------------------------------------------------
def _ln_kernel(x_ref, w_ref, b_ref, o_ref, *, k, h):
    x = x_ref[...].astype(jnp.float32)                                  # (TN, k*H)
    if k == 1:
        mean = jnp.mean(x, axis=-1, keepdims=True)
        d = x - mean
        var = jnp.mean(d * d, axis=-1, keepdims=True)                   # biased var
    else:
        blk = _chunk_block_matrix(k * h, h)                             # (kH, kH)
        inv_h = 1.0 / float(h)
        mean = jnp.dot(x, blk, preferred_element_type=jnp.float32) * inv_h
        d = x - mean
        var = jnp.dot(d * d, blk, preferred_element_type=jnp.float32) * inv_h
    # NOTE: ragged tail tiles compute on padded rows; those OOB output rows are
    # discarded by Pallas, so the garbage never reaches HBM.
    o_ref[...] = (d * lax.rsqrt(var + 1e-5) * w_ref[...] + b_ref[...]).astype(o_ref.dtype)


def _layernorm_call(x, weight, bias, *, tile_rows=None):
    N, H = x.shape
    k = _lane_packing(N, H)
    np_, hk = N // k, k * H
    xk = x.reshape(np_, hk)                                             # free reshape
    wk = jnp.tile(weight.astype(jnp.float32), (k,)).reshape(1, hk)
    bk = jnp.tile(bias.astype(jnp.float32), (k,)).reshape(1, hk)

    tn = tile_rows if tile_rows is not None else _pick_tile_rows(np_, hk * x.dtype.itemsize)
    tn = _clamp_tile_rows(tn, np_)
    nt = _cdiv(np_, tn)

    out = pl.pallas_call(
        functools.partial(_ln_kernel, k=k, h=H),
        out_shape=jax.ShapeDtypeStruct((np_, hk), x.dtype),
        grid=(nt,),
        in_specs=[
            pl.BlockSpec((tn, hk), lambda i: (i, 0)),
            pl.BlockSpec((1, hk), lambda i: (0, 0)),
            pl.BlockSpec((1, hk), lambda i: (0, 0)),
        ],
        out_specs=pl.BlockSpec((tn, hk), lambda i: (i, 0)),
        compiler_params=pltpu.CompilerParams(
            dimension_semantics=("parallel",), vmem_limit_bytes=_VMEM_LIMIT),
    )(xk, wk, bk)
    return out.reshape(N, H)


# ----------------------------------------------------------------------------
# BatchNorm1d (training-mode batch statistics)
#   fused path (x fits VMEM): one pallas_call, exact two-pass mean/var, apply.
#   tiled path: pass A accumulates per-column sum / sumsq into a resident
#   (8, kH) slab ("arbitrary"); pass B folds into scale/shift and applies
#   ("parallel"). In packed layout the k lane-groups are folded with a (kH, kH)
#   fold matmul on the MXU.
# ----------------------------------------------------------------------------
def _bn_fused_kernel(x_ref, w_ref, b_ref, o_ref, *, k, h, n_total):
    x = x_ref[...].astype(jnp.float32)                                  # (Np, kH)
    inv_n = 1.0 / float(n_total)
    s = jnp.sum(x, axis=0, keepdims=True)                               # (1, kH)
    if k > 1:
        fold = _fold_matrix(k * h, h)
        s = jnp.dot(s, fold, preferred_element_type=jnp.float32)
    mean = s * inv_n                                                    # lane-tiled mean
    d = x - mean
    v = jnp.sum(d * d, axis=0, keepdims=True)
    if k > 1:
        v = jnp.dot(v, fold, preferred_element_type=jnp.float32)
    inv_std = lax.rsqrt(v * inv_n + 1e-5)                               # EUP
    o_ref[...] = (d * (w_ref[...] * inv_std) + b_ref[...]).astype(o_ref.dtype)


def _bn_stats_kernel(x_ref, stats_ref, *, tn, n_rows):
    i = pl.program_id(0)

    @pl.when(i == 0)
    def _():
        stats_ref[...] = jnp.zeros_like(stats_ref)

    x = x_ref[...].astype(jnp.float32)                                  # (TN, kH)
    rows = i * tn + lax.broadcasted_iota(jnp.int32, (tn, 1), 0)
    xv = jnp.where(rows < n_rows, x, 0.0)                               # mask ragged tail
    s = jnp.sum(xv, axis=0, keepdims=True)
    sq = jnp.sum(xv * xv, axis=0, keepdims=True)
    pad = jnp.zeros((6, x.shape[1]), jnp.float32)
    # Dense (8, kH) update: avoids sub-8 sublane masked RMW stores on the
    # resident accumulator (rows 0 = sum, 1 = sumsq, rest padding).
    stats_ref[...] += jnp.concatenate([s, sq, pad], axis=0)


def _bn_apply_kernel(x_ref, stats_ref, w_ref, b_ref, o_ref, *, k, h, n_total):
    inv_n = 1.0 / float(n_total)
    s = stats_ref[0:1, :]
    sq = stats_ref[1:2, :]
    if k > 1:
        fold = _fold_matrix(k * h, h)
        s = jnp.dot(s, fold, preferred_element_type=jnp.float32)
        sq = jnp.dot(sq, fold, preferred_element_type=jnp.float32)
    mean = s * inv_n
    # NOTE: E[x^2] - mean^2 (single read pass) on the tiled path; clamp guards
    # tiny negative values from cancellation.
    var = jnp.maximum(sq * inv_n - mean * mean, 0.0)
    inv_std = lax.rsqrt(var + 1e-5)                                     # EUP
    scale = w_ref[...] * inv_std
    shift = b_ref[...] - mean * scale
    o_ref[...] = (x_ref[...].astype(jnp.float32) * scale + shift).astype(o_ref.dtype)


def _batchnorm_call(x, weight, bias, *, tile_rows=None, fused_bytes=_FUSED_BN_X_BYTES):
    N, H = x.shape
    k = _lane_packing(N, H)
    np_, hk = N // k, k * H
    xk = x.reshape(np_, hk)
    wk = jnp.tile(weight.astype(jnp.float32), (k,)).reshape(1, hk)
    bk = jnp.tile(bias.astype(jnp.float32), (k,)).reshape(1, hk)

    # Fused single-call path: x resident in VMEM -> ~2x HBM traffic, exact var.
    if tile_rows is None and N * H * 4 <= fused_bytes:
        out = pl.pallas_call(
            functools.partial(_bn_fused_kernel, k=k, h=H, n_total=N),
            out_shape=jax.ShapeDtypeStruct((np_, hk), x.dtype),
            grid=(1,),
            in_specs=[
                pl.BlockSpec((np_, hk), lambda i: (0, 0)),
                pl.BlockSpec((1, hk), lambda i: (0, 0)),
                pl.BlockSpec((1, hk), lambda i: (0, 0)),
            ],
            out_specs=pl.BlockSpec((np_, hk), lambda i: (0, 0)),
            compiler_params=pltpu.CompilerParams(
                dimension_semantics=("arbitrary",), vmem_limit_bytes=_VMEM_LIMIT),
        )(xk, wk, bk)
        return out.reshape(N, H)

    tn = tile_rows if tile_rows is not None else _pick_tile_rows(np_, hk * x.dtype.itemsize)
    tn = _clamp_tile_rows(tn, np_)
    nt = _cdiv(np_, tn)

    stats = pl.pallas_call(
        functools.partial(_bn_stats_kernel, tn=tn, n_rows=np_),
        out_shape=jax.ShapeDtypeStruct((8, hk), jnp.float32),
        grid=(nt,),
        in_specs=[pl.BlockSpec((tn, hk), lambda i: (i, 0))],
        out_specs=pl.BlockSpec((8, hk), lambda i: (0, 0)),               # resident accumulator
        compiler_params=pltpu.CompilerParams(
            dimension_semantics=("arbitrary",), vmem_limit_bytes=_VMEM_LIMIT),
    )(xk)

    out = pl.pallas_call(
        functools.partial(_bn_apply_kernel, k=k, h=H, n_total=N),
        out_shape=jax.ShapeDtypeStruct((np_, hk), x.dtype),
        grid=(nt,),
        in_specs=[
            pl.BlockSpec((tn, hk), lambda i: (i, 0)),
            pl.BlockSpec((8, hk), lambda i: (0, 0)),
            pl.BlockSpec((1, hk), lambda i: (0, 0)),
            pl.BlockSpec((1, hk), lambda i: (0, 0)),
        ],
        out_specs=pl.BlockSpec((tn, hk), lambda i: (i, 0)),
        compiler_params=pltpu.CompilerParams(
            dimension_semantics=("parallel",), vmem_limit_bytes=_VMEM_LIMIT),
    )(xk, stats, wk, bk)
    return out.reshape(N, H)


# ----------------------------------------------------------------------------
# GraphNorm
#   fused path (x + both one-hots fit VMEM): one pallas_call, exact two-pass
#     per-graph variance (matches the PyTorch scatter_add formulation bit-for-bit
#     up to summation order), segment reductions/broadcasts on the MXU.
#   tiled path: pass A ("arbitrary") accumulates per-graph sum/sumsq via one-hot
#     segment matmuls into a resident (2*Bp, H) slab and folds them into
#     per-graph scale/shift on the last tile; pass B ("parallel") broadcasts
#     scale/shift back per node with one-hot matmuls and applies.
#   Graph segments are contiguous; the segment table is a tiny int32 start/end
#   table built with jnp (no host sync) and padded with empty segments.
# ----------------------------------------------------------------------------
def _graph_segment_table(batch_num_nodes, n_rows):
    bn = jnp.asarray(batch_num_nodes, jnp.int32).reshape(-1)
    B = int(bn.shape[0])                                                 # static
    Bp = max(8, _round_up(B, 8))                                         # pad for sublanes
    ends_b = jnp.cumsum(bn).astype(jnp.int32)
    starts_b = (ends_b - bn).astype(jnp.int32)
    starts = jnp.full((Bp,), jnp.int32(n_rows)).at[:B].set(starts_b)     # padded: empty
    ends = jnp.full((Bp,), jnp.int32(n_rows)).at[:B].set(ends_b)
    aux_col = jnp.stack([starts, ends], axis=1)                          # (Bp, 2)
    aux_row = jnp.stack([starts, ends], axis=0)                          # (2, Bp)
    return aux_col, aux_row, Bp


def _gn_fused_kernel(x_ref, aux_col_ref, aux_row_ref, w_ref, b_ref, ms_ref, o_ref):
    x = x_ref[...].astype(jnp.float32)                                   # (N, H)
    n = x.shape[0]
    starts_c = aux_col_ref[:, 0:1]                                       # (Bp, 1)
    ends_c = aux_col_ref[:, 1:2]
    rows_r = lax.broadcasted_iota(jnp.int32, (1, n), 1)
    onehot_t = ((rows_r >= starts_c) & (rows_r < ends_c)).astype(jnp.float32)   # (Bp, N)
    starts_r = aux_row_ref[0:1, :]                                        # (1, Bp)
    ends_r = aux_row_ref[1:2, :]
    rows_c = lax.broadcasted_iota(jnp.int32, (n, 1), 0)
    onehot = ((rows_c >= starts_r) & (rows_c < ends_r)).astype(jnp.float32)     # (N, Bp)

    cnt = (ends_c - starts_c).astype(jnp.float32)                         # (Bp, 1)
    inv_cnt = jnp.where(cnt > 0, 1.0 / cnt, 0.0)                          # empty-graph safe

    sums = jnp.dot(onehot_t, x, preferred_element_type=jnp.float32)       # (Bp, H)
    mean_g = sums * inv_cnt
    mean_full = jnp.dot(onehot, mean_g, preferred_element_type=jnp.float32)  # (N, H)
    sub = x - mean_full * ms_ref[...]
    var_g = jnp.dot(onehot_t, sub * sub, preferred_element_type=jnp.float32) * inv_cnt
    scale_g = w_ref[...] * lax.rsqrt(var_g + 1e-6)                        # (Bp, H)
    scale_full = jnp.dot(onehot, scale_g, preferred_element_type=jnp.float32)  # (N, H)
    o_ref[...] = (sub * scale_full + b_ref[...]).astype(o_ref.dtype)


def _gn_stats_kernel(x_ref, aux_col_ref, w_ref, b_ref, ms_ref, ss_ref,
                     *, tn, n_rows, bp):
    i = pl.program_id(0)
    nt = pl.num_programs(0)

    @pl.when(i == 0)
    def _():
        ss_ref[...] = jnp.zeros_like(ss_ref)

    x = x_ref[...].astype(jnp.float32)                                    # (TN, H)
    row0 = i * tn
    rows_col = row0 + lax.broadcasted_iota(jnp.int32, (tn, 1), 0)          # (TN, 1)
    rows_row = row0 + lax.broadcasted_iota(jnp.int32, (1, tn), 1)          # (1, TN)
    xv = jnp.where(rows_col < n_rows, x, 0.0)                              # sanitize tail

    starts = aux_col_ref[:, 0:1]                                           # (Bp, 1)
    ends = aux_col_ref[:, 1:2]
    # Transposed one-hot built directly in (Bp, TN) orientation -> no transpose op.
    onehot_t = ((rows_row >= starts) & (rows_row < ends)).astype(jnp.float32)

    ss_ref[0:bp, :] += jnp.dot(onehot_t, xv,
                               preferred_element_type=jnp.float32)          # per-graph sum
    ss_ref[bp:2 * bp, :] += jnp.dot(onehot_t, xv * xv,
                                    preferred_element_type=jnp.float32)     # per-graph sumsq

    @pl.when(i == nt - 1)
    def _():
        cnt = (ends - starts).astype(jnp.float32)                           # (Bp, 1)
        inv_cnt = jnp.where(cnt > 0, 1.0 / cnt, 0.0)
        sums = ss_ref[0:bp, :]
        sqs = ss_ref[bp:2 * bp, :]
        mean = sums * inv_cnt                                               # (Bp, H)
        ex2 = sqs * inv_cnt
        mms = mean * ms_ref[...]                                            # mean * mean_scale
        var = jnp.maximum(ex2 - 2.0 * mms * mean + mms * mms, 0.0)
        inv_std = lax.rsqrt(var + 1e-6)                                     # EUP
        scale = w_ref[...] * inv_std                                        # (Bp, H)
        ss_ref[bp:2 * bp, :] = b_ref[...] - mms * scale                     # shift
        ss_ref[0:bp, :] = scale


def _gn_apply_kernel(x_ref, aux_row_ref, ss_ref, o_ref, *, tn, bp):
    i = pl.program_id(0)
    rows = i * tn + lax.broadcasted_iota(jnp.int32, (tn, 1), 0)             # (TN, 1)
    starts = aux_row_ref[0:1, :]                                            # (1, Bp)
    ends = aux_row_ref[1:2, :]
    onehot = ((rows >= starts) & (rows < ends)).astype(jnp.float32)         # (TN, Bp)
    scale = jnp.dot(onehot, ss_ref[0:bp, :], preferred_element_type=jnp.float32)
    shift = jnp.dot(onehot, ss_ref[bp:2 * bp, :], preferred_element_type=jnp.float32)
    o_ref[...] = (x_ref[...].astype(jnp.float32) * scale + shift).astype(o_ref.dtype)


def _graphnorm_call(x, batch_num_nodes, weight, bias, mean_scale, *,
                    tile_rows=None, fused_bytes=_FUSED_GN_X_BYTES):
    N, H = x.shape
    aux_col, aux_row, Bp = _graph_segment_table(batch_num_nodes, N)
    w2 = weight.reshape(1, H).astype(jnp.float32)
    b2 = bias.reshape(1, H).astype(jnp.float32)
    ms2 = mean_scale.reshape(1, H).astype(jnp.float32)

    # Fused single-call path: x + both (N, Bp) one-hots must fit in VMEM.
    if (tile_rows is None
            and N * H * 4 <= fused_bytes
            and N * Bp * 4 <= _ONEHOT_BUDGET_BYTES):
        return pl.pallas_call(
            _gn_fused_kernel,
            out_shape=jax.ShapeDtypeStruct((N, H), x.dtype),
            grid=(1,),
            in_specs=[
                pl.BlockSpec((N, H), lambda i: (0, 0)),
                pl.BlockSpec((Bp, 2), lambda i: (0, 0)),
                pl.BlockSpec((2, Bp), lambda i: (0, 0)),
                pl.BlockSpec((1, H), lambda i: (0, 0)),
                pl.BlockSpec((1, H), lambda i: (0, 0)),
                pl.BlockSpec((1, H), lambda i: (0, 0)),
            ],
            out_specs=pl.BlockSpec((N, H), lambda i: (0, 0)),
            compiler_params=pltpu.CompilerParams(
                dimension_semantics=("arbitrary",), vmem_limit_bytes=_VMEM_LIMIT),
        )(x, aux_col, aux_row, w2, b2, ms2)

    # Tiled two-pass path. Tile budget also accounts for the (TN, Bp) one-hot.
    if tile_rows is not None:
        tn = tile_rows
    else:
        tn = min(_pick_tile_rows(N, H * x.dtype.itemsize),
                 max(8, ((_ONEHOT_BUDGET_BYTES // (4 * Bp)) // 8) * 8))
    tn = _clamp_tile_rows(tn, N)
    nt = _cdiv(N, tn)

    # Pass A: per-graph stats -> per-graph scale/shift, resident (2*Bp, H).
    ss = pl.pallas_call(
        functools.partial(_gn_stats_kernel, tn=tn, n_rows=N, bp=Bp),
        out_shape=jax.ShapeDtypeStruct((2 * Bp, H), jnp.float32),
        grid=(nt,),
        in_specs=[
            pl.BlockSpec((tn, H), lambda i: (i, 0)),
            pl.BlockSpec((Bp, 2), lambda i: (0, 0)),
            pl.BlockSpec((1, H), lambda i: (0, 0)),
            pl.BlockSpec((1, H), lambda i: (0, 0)),
            pl.BlockSpec((1, H), lambda i: (0, 0)),
        ],
        out_specs=pl.BlockSpec((2 * Bp, H), lambda i: (0, 0)),
        compiler_params=pltpu.CompilerParams(
            dimension_semantics=("arbitrary",), vmem_limit_bytes=_VMEM_LIMIT),
    )(x, aux_col, w2, b2, ms2)

    # Pass B: broadcast back + apply, independent per row tile.
    return pl.pallas_call(
        functools.partial(_gn_apply_kernel, tn=tn, bp=Bp),
        out_shape=jax.ShapeDtypeStruct((N, H), x.dtype),
        grid=(nt,),
        in_specs=[
            pl.BlockSpec((tn, H), lambda i: (i, 0)),
            pl.BlockSpec((2, Bp), lambda i: (0, 0)),
            pl.BlockSpec((2 * Bp, H), lambda i: (0, 0)),
        ],
        out_specs=pl.BlockSpec((tn, H), lambda i: (i, 0)),
        compiler_params=pltpu.CompilerParams(
            dimension_semantics=("parallel",), vmem_limit_bytes=_VMEM_LIMIT),
    )(x, aux_row, ss)


# ----------------------------------------------------------------------------
# Module-level wrapper (matches the PyTorch NormLayer interface)
# ----------------------------------------------------------------------------
class Graph:
    def __init__(self, batch_num_nodes):
        self.batch_num_nodes = list(batch_num_nodes)


class NormLayer:
    """JAX/Pallas port of graphmae.GraphMAE_Encoder.NormLayer (forward only)."""

    def __init__(self, hidden_dim, norm_type):
        self.norm_type = norm_type
        if norm_type in ('batchnorm', 'layernorm', 'graphnorm'):
            self.weight = jnp.ones((hidden_dim,), jnp.float32)
            self.bias = jnp.zeros((hidden_dim,), jnp.float32)
            if norm_type == 'graphnorm':
                self.mean_scale = jnp.ones((hidden_dim,), jnp.float32)
        else:
            raise NotImplementedError

    def __call__(self, graph, x):
        if self.norm_type == 'batchnorm':
            # TODO(synk): running-stats (momentum) buffers / eval mode not modeled.
            return _batchnorm_call(x, self.weight, self.bias)
        if self.norm_type == 'layernorm':
            return _layernorm_call(x, self.weight, self.bias)
        return _graphnorm_call(x, graph.batch_num_nodes, self.weight,
                               self.bias, self.mean_scale)


# ----------------------------------------------------------------------------
# Pure-numpy references for correctness checks
# ----------------------------------------------------------------------------
def _layernorm_ref(x, w, b):
    x = np.asarray(x, np.float64)
    m = x.mean(-1, keepdims=True)
    v = x.var(-1, keepdims=True)
    return (x - m) / np.sqrt(v + 1e-5) * np.asarray(w) + np.asarray(b)


def _batchnorm_ref(x, w, b):
    x = np.asarray(x, np.float64)
    m = x.mean(0, keepdims=True)
    v = x.var(0, keepdims=True)
    return (x - m) / np.sqrt(v + 1e-5) * np.asarray(w) + np.asarray(b)


def _graphnorm_ref(x, batch_num_nodes, w, b, ms):
    x = np.asarray(x, dtype=np.float64)
    bn = np.asarray(batch_num_nodes)
    bidx = np.repeat(np.arange(len(bn)), bn)
    mean = np.zeros((len(bn), x.shape[1]))
    np.add.at(mean, bidx, x)
    mean = mean / bn[:, None]
    sub = x - mean[bidx] * np.asarray(ms, np.float64)
    var = np.zeros((len(bn), x.shape[1]))
    np.add.at(var, bidx, sub ** 2)
    std = np.sqrt(var / bn[:, None] + 1e-6)
    return np.asarray(w, np.float64) * sub / std[bidx] + np.asarray(b, np.float64)


if __name__ == "__main__":
    key = jax.random.PRNGKey(0)
    k_x, k_x2, k_w, k_b, k_ms = jax.random.split(key, 5)

    hidden_dim = 32
    batch_num_nodes = [5, 7, 4]            # 3 graphs, 16 nodes total
    N = sum(batch_num_nodes)
    x = jax.random.normal(k_x, (N, hidden_dim), dtype=jnp.float32)
    graph = Graph(batch_num_nodes)

    w_r = jax.random.normal(k_w, (hidden_dim,), jnp.float32)
    b_r = 0.1 * jax.random.normal(k_b, (hidden_dim,), jnp.float32)
    ms_r = 1.0 + 0.5 * jax.random.normal(k_ms, (hidden_dim,), jnp.float32)

    # --- module paths: fused GN/BN (x fits VMEM) + lane-packed LN/BN (H=32 -> k=4) ---
    gn = NormLayer(hidden_dim, 'graphnorm')
    gn.weight, gn.bias, gn.mean_scale = w_r, b_r, ms_r
    y_gn = jax.block_until_ready(gn(graph, x))
    np.testing.assert_allclose(np.asarray(y_gn),
                               _graphnorm_ref(x, batch_num_nodes, w_r, b_r, ms_r),
                               rtol=1e-4, atol=1e-4)

    ln = NormLayer(hidden_dim, 'layernorm')
    ln.weight, ln.bias = w_r, b_r
    y_ln = jax.block_until_ready(ln(graph, x))
    np.testing.assert_allclose(np.asarray(y_ln), _layernorm_ref(x, w_r, b_r),
                               rtol=1e-4, atol=1e-4)

    bnorm = NormLayer(hidden_dim, 'batchnorm')
    bnorm.weight, bnorm.bias = w_r, b_r
    y_bn = jax.block_until_ready(bnorm(graph, x))
    np.testing.assert_allclose(np.asarray(y_bn), _batchnorm_ref(x, w_r, b_r),
                               rtol=1e-4, atol=1e-4)

    # --- tiled two-pass paths with ragged boundaries (forced small tiles,
    #     N=21 is not a multiple of 8 and disables lane-packing) ---
    bn2 = [6, 9, 2, 4]                     # 4 graphs, 21 nodes
    N2 = sum(bn2)
    x2 = jax.random.normal(k_x2, (N2, hidden_dim), dtype=jnp.float32)

    y2_gn = jax.block_until_ready(
        _graphnorm_call(x2, bn2, w_r, b_r, ms_r, tile_rows=8))
    np.testing.assert_allclose(np.asarray(y2_gn),
                               _graphnorm_ref(x2, bn2, w_r, b_r, ms_r),
                               rtol=1e-4, atol=1e-4)

    y2_ln = jax.block_until_ready(_layernorm_call(x2, w_r, b_r, tile_rows=8))
    np.testing.assert_allclose(np.asarray(y2_ln), _layernorm_ref(x2, w_r, b_r),
                               rtol=1e-4, atol=1e-4)

    y2_bn = jax.block_until_ready(_batchnorm_call(x2, w_r, b_r, tile_rows=8))
    np.testing.assert_allclose(np.asarray(y2_bn), _batchnorm_ref(x2, w_r, b_r),
                               rtol=1e-4, atol=1e-4)

    # --- tiled BN path in the lane-packed layout (N=16, k=4, forced tiles) ---
    y3_bn = jax.block_until_ready(_batchnorm_call(x, w_r, b_r, tile_rows=8))
    np.testing.assert_allclose(np.asarray(y3_bn), _batchnorm_ref(x, w_r, b_r),
                               rtol=1e-4, atol=1e-4)

    print("KERNEL_OK")
</pallas_src>

<mosaic_0001>
module attributes {stable_mosaic.version = 11 : i64} {
  func.func @_gn_fused_kernel(%arg0: i32, %arg1: memref<16x32xf32, #tpu.memory_space<vmem>>, %arg2: memref<8x2xi32, #tpu.memory_space<vmem>>, %arg3: memref<2x8xi32, #tpu.memory_space<vmem>>, %arg4: memref<1x32xf32, #tpu.memory_space<vmem>>, %arg5: memref<1x32xf32, #tpu.memory_space<vmem>>, %arg6: memref<1x32xf32, #tpu.memory_space<vmem>>, %arg7: memref<16x32xf32, #tpu.memory_space<vmem>>) attributes {dimension_semantics = [#tpu.dimension_semantics<arbitrary>], iteration_bounds = array<i64: 1>, scalar_prefetch = 0 : i64, scratch_operands = 0 : i64, tpu.core_type = #tpu.core_type<tc>, window_params = [{pipeline_mode = #tpu.pipeline_mode<synchronous>, transform_indices = @transform_0, window_bounds = array<i64: 16, 32>}, {pipeline_mode = #tpu.pipeline_mode<synchronous>, transform_indices = @transform_1, window_bounds = array<i64: 8, 2>}, {pipeline_mode = #tpu.pipeline_mode<synchronous>, transform_indices = @transform_2, window_bounds = array<i64: 2, 8>}, {pipeline_mode = #tpu.pipeline_mode<synchronous>, transform_indices = @transform_3, window_bounds = array<i64: 1, 32>}, {pipeline_mode = #tpu.pipeline_mode<synchronous>, transform_indices = @transform_4, window_bounds = array<i64: 1, 32>}, {pipeline_mode = #tpu.pipeline_mode<synchronous>, transform_indices = @transform_5, window_bounds = array<i64: 1, 32>}, {pipeline_mode = #tpu.pipeline_mode<synchronous>, transform_indices = @transform_6, window_bounds = array<i64: 16, 32>}]} {
    %c0 = arith.constant 0 : index
    %c0_0 = arith.constant 0 : index
    %0 = vector.load %arg1[%c0, %c0_0] : memref<16x32xf32, #tpu.memory_space<vmem>>, vector<16x32xf32>
    %c0_1 = arith.constant 0 : index
    %c0_2 = arith.constant 0 : index
    %1 = vector.load %arg2[%c0_1, %c0_2] : memref<8x2xi32, #tpu.memory_space<vmem>>, vector<8x1xi32>
    %c0_3 = arith.constant 0 : index
    %c1 = arith.constant 1 : index
    %2 = vector.load %arg2[%c0_3, %c1] : memref<8x2xi32, #tpu.memory_space<vmem>>, vector<8x1xi32>
    %3 = tpu.iota {dimensions = array<i32: 1>} : vector<1x16xi32>
    %4 = vector.broadcast %3 : vector<1x16xi32> to vector<8x16xi32>
    %5 = vector.broadcast %1 : vector<8x1xi32> to vector<8x16xi32>
    %6 = arith.cmpi sge, %4, %5 : vector<8x16xi32>
    %7 = vector.broadcast %3 : vector<1x16xi32> to vector<8x16xi32>
    %8 = vector.broadcast %2 : vector<8x1xi32> to vector<8x16xi32>
    %9 = arith.cmpi slt, %7, %8 : vector<8x16xi32>
    %10 = arith.andi %6, %9 : vector<8x16xi1>
    %11 = arith.extui %10 : vector<8x16xi1> to vector<8x16xi32>
    %12 = arith.sitofp %11 : vector<8x16xi32> to vector<8x16xf32>
    %c0_4 = arith.constant 0 : index
    %c0_5 = arith.constant 0 : index
    %13 = vector.load %arg3[%c0_4, %c0_5] : memref<2x8xi32, #tpu.memory_space<vmem>>, vector<1x8xi32>
    %c1_6 = arith.constant 1 : index
    %c0_7 = arith.constant 0 : index
    %14 = vector.load %arg3[%c1_6, %c0_7] : memref<2x8xi32, #tpu.memory_space<vmem>>, vector<1x8xi32>
    %15 = tpu.iota {dimensions = array<i32: 0>} : vector<16x1xi32>
    %16 = vector.broadcast %15 : vector<16x1xi32> to vector<16x8xi32>
    %17 = vector.broadcast %13 : vector<1x8xi32> to vector<16x8xi32>
    %18 = arith.cmpi sge, %16, %17 : vector<16x8xi32>
    %19 = vector.broadcast %15 : vector<16x1xi32> to vector<16x8xi32>
    %20 = vector.broadcast %14 : vector<1x8xi32> to vector<16x8xi32>
    %21 = arith.cmpi slt, %19, %20 : vector<16x8xi32>
    %22 = arith.andi %18, %21 : vector<16x8xi1>
    %23 = arith.extui %22 : vector<16x8xi1> to vector<16x8xi32>
    %24 = arith.sitofp %23 : vector<16x8xi32> to vector<16x8xf32>
    %25 = arith.subi %2, %1 : vector<8x1xi32>
    %26 = arith.sitofp %25 : vector<8x1xi32> to vector<8x1xf32>
    %cst = arith.constant 0.000000e+00 : f32
    %27 = vector.broadcast %cst : f32 to vector<8x1xf32>
    %28 = arith.cmpf ogt, %26, %27 : vector<8x1xf32>
    %cst_8 = arith.constant 1.000000e+00 : f32
    %29 = vector.broadcast %cst_8 : f32 to vector<8x1xf32>
    %30 = arith.divf %29, %26 : vector<8x1xf32>
    %cst_9 = arith.constant 0.000000e+00 : f32
    %31 = vector.broadcast %cst_9 : f32 to vector<8x1xf32>
    %32 = arith.select %28, %30, %31 : vector<8x1xi1>, vector<8x1xf32>
    %cst_10 = arith.constant dense<0.000000e+00> : vector<8x32xf32>
    %33 = tpu.matmul %12, %0, %cst_10 {dimension_numbers = #tpu.dot_dimension_numbers<[1], [0], [0], [1], [0, 0, 1, 1], [], []>} : vector<8x16xf32>, vector<16x32xf32>, vector<8x32xf32> -> vector<8x32xf32>
    %34 = vector.broadcast %32 : vector<8x1xf32> to vector<8x32xf32>
    %35 = arith.mulf %33, %34 : vector<8x32xf32>
    %cst_11 = arith.constant dense<0.000000e+00> : vector<16x32xf32>
    %36 = tpu.matmul %24, %35, %cst_11 {dimension_numbers = #tpu.dot_dimension_numbers<[1], [0], [0], [1], [0, 0, 1, 1], [], []>} : vector<16x8xf32>, vector<8x32xf32>, vector<16x32xf32> -> vector<16x32xf32>
    %c0_12 = arith.constant 0 : index
    %c0_13 = arith.constant 0 : index
    %37 = vector.load %arg6[%c0_12, %c0_13] : memref<1x32xf32, #tpu.memory_space<vmem>>, vector<1x32xf32>
    %38 = vector.broadcast %37 : vector<1x32xf32> to vector<16x32xf32>
    %39 = arith.mulf %36, %38 : vector<16x32xf32>
    %40 = arith.subf %0, %39 : vector<16x32xf32>
    %41 = arith.mulf %40, %40 : vector<16x32xf32>
    %cst_14 = arith.constant dense<0.000000e+00> : vector<8x32xf32>
    %42 = tpu.matmul %12, %41, %cst_14 {dimension_numbers = #tpu.dot_dimension_numbers<[1], [0], [0], [1], [0, 0, 1, 1], [], []>} : vector<8x16xf32>, vector<16x32xf32>, vector<8x32xf32> -> vector<8x32xf32>
    %43 = vector.broadcast %32 : vector<8x1xf32> to vector<8x32xf32>
    %44 = arith.mulf %42, %43 : vector<8x32xf32>
    %c0_15 = arith.constant 0 : index
    %c0_16 = arith.constant 0 : index
    %45 = vector.load %arg4[%c0_15, %c0_16] : memref<1x32xf32, #tpu.memory_space<vmem>>, vector<1x32xf32>
    %cst_17 = arith.constant 9.99999997E-7 : f32
    %46 = vector.broadcast %cst_17 : f32 to vector<8x32xf32>
    %47 = arith.addf %44, %46 : vector<8x32xf32>
    %48 = math.rsqrt %47 : vector<8x32xf32>
    %49 = vector.broadcast %45 : vector<1x32xf32> to vector<8x32xf32>
    %50 = arith.mulf %49, %48 : vector<8x32xf32>
    %cst_18 = arith.constant dense<0.000000e+00> : vector<16x32xf32>
    %51 = tpu.matmul %24, %50, %cst_18 {dimension_numbers = #tpu.dot_dimension_numbers<[1], [0], [0], [1], [0, 0, 1, 1], [], []>} : vector<16x8xf32>, vector<8x32xf32>, vector<16x32xf32> -> vector<16x32xf32>
    %52 = arith.mulf %40, %51 : vector<16x32xf32>
    %c0_19 = arith.constant 0 : index
    %c0_20 = arith.constant 0 : index
    %53 = vector.load %arg5[%c0_19, %c0_20] : memref<1x32xf32, #tpu.memory_space<vmem>>, vector<1x32xf32>
    %54 = vector.broadcast %53 : vector<1x32xf32> to vector<16x32xf32>
    %55 = arith.addf %52, %54 : vector<16x32xf32>
    %c0_21 = arith.constant 0 : index
    %c0_22 = arith.constant 0 : index
    %56 = vector.load %arg7[%c0_21, %c0_22] : memref<16x32xf32, #tpu.memory_space<vmem>>, vector<16x32xf32>
    tpu.vector_store %arg7[%c0_21, %c0_22], %55 {strides = array<i32>} : memref<16x32xf32, #tpu.memory_space<vmem>>, vector<16x32xf32>,
    return
  }
  func.func @transform_0(%arg0: i32) -> (i32, i32) {
    %c0_i32 = arith.constant 0 : i32
    %c0_i32_0 = arith.constant 0 : i32
    %c0_i32_1 = arith.constant 0 : i32
    return %c0_i32, %c0_i32_0 : i32, i32
  }
  func.func @transform_1(%arg0: i32) -> (i32, i32) {
    %c0_i32 = arith.constant 0 : i32
    %c0_i32_0 = arith.constant 0 : i32
    %c0_i32_1 = arith.constant 0 : i32
    return %c0_i32, %c0_i32_0 : i32, i32
  }
  func.func @transform_2(%arg0: i32) -> (i32, i32) {
    %c0_i32 = arith.constant 0 : i32
    %c0_i32_0 = arith.constant 0 : i32
    %c0_i32_1 = arith.constant 0 : i32
    return %c0_i32, %c0_i32_0 : i32, i32
  }
  func.func @transform_3(%arg0: i32) -> (i32, i32) {
    %c0_i32 = arith.constant 0 : i32
    %c0_i32_0 = arith.constant 0 : i32
    %c0_i32_1 = arith.constant 0 : i32
    return %c0_i32, %c0_i32_0 : i32, i32
  }
  func.func @transform_4(%arg0: i32) -> (i32, i32) {
    %c0_i32 = arith.constant 0 : i32
    %c0_i32_0 = arith.constant 0 : i32
    %c0_i32_1 = arith.constant 0 : i32
    return %c0_i32, %c0_i32_0 : i32, i32
  }
  func.func @transform_5(%arg0: i32) -> (i32, i32) {
    %c0_i32 = arith.constant 0 : i32
    %c0_i32_0 = arith.constant 0 : i32
    %c0_i32_1 = arith.constant 0 : i32
    return %c0_i32, %c0_i32_0 : i32, i32
  }
  func.func @transform_6(%arg0: i32) -> (i32, i32) {
    %c0_i32 = arith.constant 0 : i32
    %c0_i32_0 = arith.constant 0 : i32
    %c0_i32_1 = arith.constant 0 : i32
    return %c0_i32, %c0_i32_0 : i32, i32
  }
}

</mosaic_0001>

<bundles_post_ra>
// kernel: tpu_custom_call.1
= control target key start
LH: loop header
LB: loop body
LE: loop exit
PB: predicated region body
PF: predicated region fallthrough
CT: control target
= control target key end

     0   :  { %11 = vsyncpa [#allocation3], 0  ;;  %s669_s0 = inlined_call_operand.hbm [shape: f32[16,32], index: 0, kind: input, shape index: {}]   ;;  %s670_s1 = inlined_call_operand.vmem [shape: s32[8,2], index: 1, kind: input, shape index: {}]   ;;  %s671_s2 = inlined_call_operand.vmem [shape: s32[2,8], index: 2, kind: input, shape index: {}]   ;;  %s672_s3 = inlined_call_operand.vmem [shape: f32[1,32], index: 3, kind: input, shape index: {}]   ;;  %s673_s4 = inlined_call_operand.vmem [shape: f32[1,32], index: 4, kind: input, shape index: {}]   ;;  %s674_s5 = inlined_call_operand.vmem [shape: f32[1,32], index: 5, kind: input, shape index: {}]   ;;  %s675_s6 = inlined_call_operand.hbm [shape: f32[16,32], index: 6, kind: output, shape index: {}]  }
   0x1   :  { %12 = vsyncpa [#allocation4], 0  ;;  %s568_s21 = smov [#allocation2]   ;;  %s520_s25 = scalar_lea.hbm %s669_s0, 256 }
   0x2   :  { %s18_s22 = sshll.u32 %s568_s21, 4  ;;  %p521_p0 = scmp.ne.s32.totalorder %s669_s0, %s520_s25  ;;  %s19_s22 = int_to_ptr.vmem [resolvable:$true] %s18_s22 }
   0x3   :  { %p524_p1 = scmp.lt.u32.totalorder %s520_s25, %s669_s0 }
   0x5   :  { %p526_p2 = pnand %p524_p1, %p521_p0 }
   0x7   :  { %529 = shalt.err (!%p526_p2)
}
   0x8   :  { %s530_s30 = scalar_lea.vmem %s19_s22, 256  ;;  %p535_p4 = scmp.lt.s32.totalorder %s19_s22, %s19_s22 }
   0x9   :  { %p531_p3 = scmp.ne.s32.totalorder %s19_s22, %s530_s30  ;;  %p536_p5 = scmp.lt.s32.totalorder %s530_s30, %s530_s30 }
   0xb   :  { %p537_p6 = por %p536_p5, %p535_p4 }
   0xd   :  { %p538_p7 = pnand %p537_p6, %p531_p3 }
   0xf   :  { %541 = shalt.err (!%p538_p7)
}
  0x10   :  { %s569_s7 = smov 128   ;;  %s570_s8 = smov 8  }
  0x11   :  { %24 = dma.hbm_to_vmem [thread:$0]  %s669_s0, 256, %s19_s22, [#allocation3], %s569_s7, %s569_s7, %s570_s8  }
  0x12   :  { %564 = dma.done.wait [#allocation3], 256  }
  0x13   :  { %565 = vsyncadd [#allocation3], 4294967040  ;;  %v571_v0 = vmov 0   ;;  %v572_v1 = vmov 1   ;;  %v40_v2 = vld [vmem:[%s670_s1] sm:$0xff]  ;;  %s573_s13 = smov 1   ;;  %v41_v11 = vlaneseq }
  0x14   :  { %513 = vset.pattern.permute.xlu0 %v571_v0  ;;  %515 = vset.pattern.permute.xlu1 %v572_v1  ;;  %v574_v3 = vmov 0.0|0.0   ;;  %v38_v4 = vld [vmem:[#allocation2] sm:$0xff]  ;;  %v39_v5 = vld [vmem:[#allocation2 + $0x8] sm:$0xff]  ;;  %vm575_vm0 = vmmov 0   ;;  %v576_v7 = vmov 0.0   ;;  %vm85_vm4 = vcmask 130048  }
  0x15   :  { %44 = vperm.xlu0 %513, %v40_v2   ;;  %77 = vrot.lane.b32.xlu1 %v40_v2, %s573_s13  ;;  %v498_v6 = vpack.c.bf16 %v39_v5, %v38_v4  ;;  %v42_v14 = vand.u32 127, %v41_v11  ;;  %v57_v18 = vshrl.u32 %v41_v11, 7  ;;  %v448_v19 = vld [vmem:[%s671_s2] ss:$0 sm:$0xff]  ;;  %v449_v20 = vld [vmem:[%s671_s2 + $0x1] ss:$0 sm:$0xff] }
  0x16   :  { %497 = vmatprep.subr.bf16.mxu0 %v574_v3  ;;  %477 = vmatprep.mubr.msk.f32.mxu0 %vm575_vm0, %v576_v7  ;;  %vm165_vm11 = vcmask 64512   ;;  %v455_v28 = vld [vmem:[%s674_s5] ss:$0 sm:$0xff]  ;;  %s577_s20 = smov [#allocation5]   ;;  %vm427_vm13 = vcmask 261120  }
  0x17   :  { %499 = vmatpush3.bf16.msra.mxu0 %v498_v6  ;;  %v58_v21 = vadd.s32 8, %v57_v18  ;;  %vm63_vm6 = vcmp.ge.s32.totalorder %v57_v18, %v448_v19  ;;  %vm69_vm7 = vcmp.lt.s32.totalorder %v57_v18, %v449_v20  ;;  %v457_v42 = vld [vmem:[%s672_s3] ss:$0 sm:$0xff]  ;;  %s435_s21 = sshll.u32 %s577_s20, 4  ;;  %s436_s21 = int_to_ptr.vmem [resolvable:$true] %s435_s21 }
  0x18   :  { %vm71_vm10 = vmand %vm63_vm6, %vm69_vm7  ;;  %v460_v46 = vld [vmem:[%s673_s4] ss:$0 sm:$0xff]  ;;  %s542_s3 = scalar_lea.vmem %s436_s21, 256  ;;  %p547_p9 = scmp.lt.s32.totalorder %s436_s21, %s436_s21 }
  0x19   :  { %514 = vset.pattern.permute.xlu0 %v572_v1  ;;  %vm64_vm8 = vcmp.ge.s32.totalorder %v58_v21, %v448_v19  ;;  %vm70_vm9 = vcmp.lt.s32.totalorder %v58_v21, %v449_v20  ;;  %v450_v22 = vsel %vm71_vm10, 1.0, %v576_v7  ;;  %p543_p8 = scmp.ne.s32.totalorder %s436_s21, %s542_s3  ;;  %p548_p10 = scmp.lt.s32.totalorder %s542_s3, %s542_s3 }
  0x1a   :  { %48 = vperm.xlu0 %514, %v40_v2   ;;  %vm72_vm12 = vmand %vm64_vm8, %vm70_vm9  ;;  %482 = vmatprep.mubr.msk.f32.mxu1 %vm165_vm11, %v450_v22 }
  0x1b   :  { %v451_v27 = vsel %vm72_vm12, 1.0, %v576_v7  ;;  %p549_p11 = por %p548_p10, %p547_p9 }
  0x1d   :  { %p550_p12 = pnand %p549_p11, %p543_p8 }
  0x87   :  { %v78_v8 = vpop.permute.xlu1 %77 }
  0x88   :  { %v79_v9 = vsub.s32 %v40_v2, %v78_v8 }
  0x8a   :  { %v80_v10 = vcvt.s32.f32 %v79_v9 }
  0x8c   :  { %516 = vrcp.f32 %v80_v10  ;;  %vm81_vm1 = vcmp.gt.f32.partialorder %v80_v10, 0.0 }
  0x94   :  { %v45_v12 = vpop.permute.xlu0 %44 }
  0x95   :  { %vm46_vm2 = vcmp.ge.s32.totalorder %v42_v14, %v45_v12 }
  0x96   :  { %v517_v13 = vpop.eup %516 }
  0x97   :  { %v84_v15 = vsel %vm81_vm1, %v517_v13, 0.0 }
  0x98   :  { %161 = vperm.xlu1 %515, %v84_v15  }
  0x99   :  { %v49_v16 = vpop.permute.xlu0 %48 }
  0x9a   :  { %vm50_vm3 = vcmp.lt.s32.totalorder %v42_v14, %v49_v16 }
  0x9b   :  { %vm51_vm5 = vmand %vm46_vm2, %vm50_vm3 }
  0x9c   :  { %v447_v17 = vsel %vm51_vm5, 1.0, %v576_v7 }
  0x9d   :  { %478 = vmatmul.mubr.msk.f32.vlgmr.msra.gmra.mrb[0].mxu0 %vm85_vm4, %v447_v17 }
  0x9e   :  { %494 = vmatprep.mubr.msk.f32.mxu0 %vm165_vm11, %v450_v22 }
 0x117   :  { %v162_v23 = vpop.permute.xlu1 %161 }
 0x170   :  { %v155_v24 = vpop.f32.mrb[0].mxu0 }
 0x171   :  { %v164_v25 = vmul.f32 %v162_v23, %v155_v24  ;;  %v479_v26 = vpop.f32.mrb[1].mxu0 }
 0x173   :  { %480 = vmatprep.subr.mxu1 %v164_v25 }
 0x174   :  { %481 = vmatpush3.msra.mxu1 %v164_v25 }
 0x175   :  { %483 = vmatmul.mubr.msk.f32.vlgmr.msra.gmra.mrb[0].mxu1 %vm165_vm11, %v451_v27  ;;  %500 = vmatprep.subr.bf16.mxu1 %v574_v3 }
 0x176   :  { %489 = vmatprep.mubr.msk.f32.mxu1 %vm575_vm0, %v576_v7 }
 0x248   :  { %v484_v29 = vpop.f32.mrb[0].mxu1 }
 0x249   :  { %v255_v30 = vmul.f32 %v484_v29, %v455_v28  ;;  %v238_v31 = vpop.f32.mrb[1].mxu1 }
 0x24a   :  { %v254_v32 = vmul.f32 %v455_v28, %v238_v31 }
 0x24b   :  { %v257_v33 = vsub.f32 %v39_v5, %v255_v30 }
 0x24c   :  { %v256_v34 = vsub.f32 %v38_v4, %v254_v32 }
 0x24d   :  { %v259_v35 = vmul.f32 %v257_v33, %v257_v33 }
 0x24e   :  { %v258_v36 = vmul.f32 %v256_v34, %v256_v34 }
 0x250   :  { %v501_v37 = vpack.c.bf16 %v259_v35, %v258_v36 }
 0x252   :  { %502 = vmatpush3.bf16.msra.mxu1 %v501_v37 }
 0x255   :  { %490 = vmatmul.mubr.msk.f32.vlgmr.msra.gmra.mrb[2].mxu1 %vm85_vm4, %v447_v17 }
 0x328   :  { %v326_v38 = vpop.f32.mrb[2].mxu1 }
 0x329   :  { %v330_v39 = vmul.f32 %v326_v38, %v162_v23  ;;  %v491_v40 = vpop.f32.mrb[3].mxu1 }
 0x32b   :  { %v332_v41 = vadd.f32 1e-06, %v330_v39 }
 0x32d   :  { %518 = vrsqrt.f32 %v332_v41 }
 0x337   :  { %v519_v43 = vpop.eup %518 }
 0x338   :  { %v340_v44 = vmul.f32 %v519_v43, %v457_v42 }
 0x33a   :  { %492 = vmatprep.subr.mxu0 %v340_v44 }
 0x33b   :  { %493 = vmatpush3.msra.mxu0 %v340_v44 }
 0x33c   :  { %495 = vmatmul.mubr.msk.f32.vlgmr.msra.gmra.mrb[2].mxu0 %vm165_vm11, %v451_v27 }
 0x40f   :  { %v496_v45 = vpop.f32.mrb[2].mxu0 }
 0x410   :  { %v417_v47 = vmul.f32 %v496_v45, %v257_v33  ;;  %v407_v48 = vpop.f32.mrb[3].mxu0 }
 0x411   :  { %v416_v49 = vmul.f32 %v407_v48, %v256_v34 }
 0x412   :  { %v426_v50 = vadd.f32 %v460_v46, %v417_v47 }
 0x413   :  { %v425_v51 = vadd.f32 %v460_v46, %v416_v49 }
 0x414   :  { %429 = vst.msk [vmem:[#allocation5 + $0x8] sm:$0xff] %vm427_vm13, %v426_v50 }
 0x415   :  { %428 = vst.msk [vmem:[#allocation5] sm:$0xff] %vm427_vm13, %v425_v51 }
 0x416   :  { %553 = shalt.err (!%p550_p12)
}
 0x417   :  { %s554_s23 = scalar_lea.hbm %s675_s6, 256 }
 0x418   :  { %p555_p13 = scmp.ne.s32.totalorder %s675_s6, %s554_s23  ;;  %p558_p0 = scmp.lt.u32.totalorder %s554_s23, %s675_s6 }
 0x41a   :  { %p560_p1 = pnand %p558_p0, %p555_p13 }
 0x41c   :  { %563 = shalt.err (!%p560_p1)
}
 0x41d   :  { %441 = dma.vmem_to_hbm [thread:$0]  %s436_s21, 256, %s675_s6, [#allocation4], %s569_s7, %s569_s7, %s570_s8  }
 0x41e   :  { %566 = dma.done.wait [#allocation4], 256  }
 0x41f   :  { %567 = vsyncadd [#allocation4], 4294967040 }
 0x420   :  { %445 = vsyncpa [#allocation3], 1 }
 0x421   :  { %446 = vsyncpa [#allocation4], 1 }

</bundles_post_ra>
